<compile_context>
chip_gen: v5e
topology: v5e:2x2
jax: 0.10.0
libtpu: 0.0.40
codegen_flags: <defaults>
</compile_context>

<pallas_src>
import functools

import jax
import jax.numpy as jnp
from jax.experimental import pallas as pl
from jax.experimental.pallas import tpu as pltpu


def _round_up(a, m):
    return (a + m - 1) // m * m


def softmax_loss_kernel(x_ref, w_ref, b_ref, lab_ref,          # inputs
                        loss_ref, corr_ref,                    # per-batch-tile sums
                        m_ref, l_ref, t_ref, am_ref,           # VMEM scratch
                        *, n_classes, n_rows, tb, tc, mask_classes):
    i = pl.program_id(0)              # batch tile
    k = pl.program_id(1)              # class tile (reduction axis, innermost)
    nk = pl.num_programs(1)

    @pl.when(k == 0)
    def _init():
        m_ref[...] = jnp.full_like(m_ref, -jnp.inf)   # running row max
        l_ref[...] = jnp.zeros_like(l_ref)            # running exp-sum
        t_ref[...] = jnp.zeros_like(t_ref)            # true-class logit
        am_ref[...] = jnp.zeros_like(am_ref)          # running argmax (f32 index)

    # MXU: (TB, F) x (F, TC) with f32 accumulation; weight already (F, TC) so
    # the class dim is lane-dense and no in-kernel transpose is needed.
    logits = jnp.dot(x_ref[...], w_ref[...], preferred_element_type=jnp.float32)
    logits = logits + b_ref[...].astype(jnp.float32)           # (TB, TC)

    # Global class ids of this tile (needed for argmax index + true-class hit).
    col = jax.lax.broadcasted_iota(jnp.int32, (tb, tc), 1) + k * tc
    if mask_classes:
        # Only the last class tile can hold padding; cheap select, skipped
        # entirely (statically) when C is already a multiple of TC.
        logits_v = jnp.where(col < n_classes, logits, jnp.float32(-jnp.inf))
    else:
        logits_v = logits

    tile_max = jnp.max(logits_v, axis=-1, keepdims=True)       # (TB, 1)

    # First-index argmax inside the tile (torch.topk tie-break).  Index carried
    # as f32 — exact for n_classes < 2^24.
    colf = col.astype(jnp.float32)
    tile_arg = jnp.min(jnp.where(logits_v == tile_max, colf, jnp.float32(3.0e38)),
                       axis=-1, keepdims=True)                 # (TB, 1)

    # Online logsumexp merge.
    m_old = m_ref[...]
    m_new = jnp.maximum(m_old, tile_max)
    l_ref[...] = (l_ref[...] * jnp.exp(m_old - m_new)
                  + jnp.sum(jnp.exp(logits_v - m_new), axis=-1, keepdims=True))
    m_ref[...] = m_new

    # Running argmax: a strictly greater tile max wins; ties keep the earlier
    # (lower) class index, matching torch.topk evaluation order.
    am_ref[...] = jnp.where(tile_max > m_old, tile_arg, am_ref[...])

    # True-class logit contribution from this tile only.
    lab = lab_ref[...]                                          # (TB, 1) int32
    t_ref[...] = t_ref[...] + jnp.sum(jnp.where(col == lab, logits, 0.0),
                                      axis=-1, keepdims=True)

    @pl.when(k == nk - 1)
    def _finalize():
        lse = m_ref[...] + jnp.log(l_ref[...])                  # (TB, 1)
        loss_rows = lse - t_ref[...]                            # per-row CE loss
        corr_rows = (am_ref[...] == lab_ref[...].astype(jnp.float32)
                     ).astype(jnp.float32)                      # per-row top-1 hit
        # Mask padded batch rows and reduce in-kernel -> tiny lane-dense output.
        row = jax.lax.broadcasted_iota(jnp.int32, (tb, 1), 0) + i * tb
        valid = row < n_rows
        loss_sum = jnp.sum(jnp.where(valid, loss_rows, 0.0))
        corr_sum = jnp.sum(jnp.where(valid, corr_rows, 0.0))
        loss_ref[...] = jnp.full(loss_ref.shape, loss_sum, jnp.float32)
        corr_ref[...] = jnp.full(corr_ref.shape, corr_sum, jnp.float32)


def softmax_loss(x, weight, bias, labels, *, tb=None, tc=None, compute_dtype=None):
    """x: (B, in_feats); weight: (n_classes, in_feats) as in nn.Linear;
    bias: (n_classes,); labels: (B,) int.  Returns (mean CE loss, top-1 %).

    compute_dtype=jnp.bfloat16 casts x/weight (halves weight HBM traffic and
    uses the MXU bf16 path); accumulation remains f32."""
    B, F = x.shape
    C, Fw = weight.shape
    assert Fw == F, (weight.shape, x.shape)

    TC = tc if tc is not None else (256 if C >= 256 else 128)
    F_pad = _round_up(F, 128)
    C_pad = _round_up(C, TC)

    x_bytes = jnp.dtype(compute_dtype).itemsize if compute_dtype else jnp.dtype(x.dtype).itemsize
    w_bytes = jnp.dtype(compute_dtype).itemsize if compute_dtype else jnp.dtype(weight.dtype).itemsize

    # Batch tile: as large as a ~40 MiB VMEM budget allows (safe on v7x's
    # 64 MiB/TC), capped at 512 so batches > 512 still give >= 2 parallel
    # batch tiles for v7x's two TensorCores.
    if tb is None:
        TB = min(512, _round_up(B, 8))
        budget = 40 * 1024 * 1024
        while TB > 8:
            foot = (2 * TB * F_pad * x_bytes          # x (double-buffered)
                    + 2 * F_pad * TC * w_bytes        # weight tile (double-buffered)
                    + 6 * TB * TC * 4)                # (TB,TC) f32 temporaries
            if foot <= budget:
                break
            TB = max(8, _round_up(TB // 2, 8))
    else:
        TB = _round_up(tb, 8)
    B_pad = _round_up(B, TB)

    # Pad (no-op for already aligned shapes); transpose weight ONCE so the
    # kernel's class dim is lane-dense.
    xp = x
    if (B_pad, F_pad) != (B, F):
        xp = jnp.pad(xp, ((0, B_pad - B), (0, F_pad - F)))
    wT = weight.T                                        # (F, C), single XLA pass
    if (F_pad, C_pad) != (F, C):
        wT = jnp.pad(wT, ((0, F_pad - F), (0, C_pad - C)))
    if compute_dtype is not None:
        xp = xp.astype(compute_dtype)
        wT = wT.astype(compute_dtype)
    b2 = bias.reshape(1, C).astype(jnp.float32)
    if C_pad != C:
        b2 = jnp.pad(b2, ((0, 0), (0, C_pad - C)))
    lab = labels.reshape(B, 1).astype(jnp.int32)
    if B_pad != B:
        lab = jnp.pad(lab, ((0, B_pad - B), (0, 0)))

    NBT = B_pad // TB
    grid = (NBT, C_pad // TC)

    # VMEM limit: actual footprint + headroom, capped at 64 MiB (v7x-safe).
    foot = (2 * TB * F_pad * x_bytes + 2 * F_pad * TC * w_bytes
            + 2 * TC * 4 + 2 * TB * 4            # bias + labels
            + 8 * TB * TC * 4                    # in-kernel temporaries
            + 4 * TB * 4 + 4 * 8 * 128 * 4)      # scratch + outputs
    vmem_limit = int(min(64 * 1024 * 1024, max(32 * 1024 * 1024, foot)))

    kernel = functools.partial(softmax_loss_kernel, n_classes=C, n_rows=B,
                               tb=TB, tc=TC, mask_classes=(C_pad != C))

    loss_sums, corr_sums = pl.pallas_call(
        kernel,
        out_shape=(jax.ShapeDtypeStruct((NBT, 8, 128), jnp.float32),
                   jax.ShapeDtypeStruct((NBT, 8, 128), jnp.float32)),
        grid_spec=pltpu.PrefetchScalarGridSpec(
            num_scalar_prefetch=0,
            grid=grid,
            in_specs=[
                pl.BlockSpec((TB, F_pad), lambda i, k: (i, 0)),   # x tile (resident over k)
                pl.BlockSpec((F_pad, TC), lambda i, k: (0, k)),   # weight tile (lane-dense C)
                pl.BlockSpec((1, TC), lambda i, k: (0, k)),       # bias slice
                pl.BlockSpec((TB, 1), lambda i, k: (i, 0)),       # labels
            ],
            out_specs=(
                pl.BlockSpec((1, 8, 128), lambda i, k: (i, 0, 0)),  # loss sum / batch tile
                pl.BlockSpec((1, 8, 128), lambda i, k: (i, 0, 0)),  # correct sum / batch tile
            ),
            scratch_shapes=[
                pltpu.VMEM((TB, 1), jnp.float32),   # running max
                pltpu.VMEM((TB, 1), jnp.float32),   # running exp-sum
                pltpu.VMEM((TB, 1), jnp.float32),   # true-class logit
                pltpu.VMEM((TB, 1), jnp.float32),   # running argmax index
            ]),
        compiler_params=pltpu.CompilerParams(
            dimension_semantics=("parallel", "arbitrary"),
            vmem_limit_bytes=vmem_limit),
    )(xp, wT, b2, lab)

    # Tiny epilogue: sum the per-batch-tile partials.
    loss = jnp.sum(loss_sums[:, 0, 0]) / B
    prec1 = 100.0 * jnp.sum(corr_sums[:, 0, 0]) / B
    return loss, prec1


def reference(x, weight, bias, labels):
    logits = x @ weight.T + bias
    lse = jax.nn.logsumexp(logits, axis=-1)
    true_logit = jnp.take_along_axis(logits, labels[:, None], axis=-1)[:, 0]
    loss = jnp.mean(lse - true_logit)
    prec1 = 100.0 * jnp.mean((jnp.argmax(logits, axis=-1) == labels).astype(jnp.float32))
    return loss, prec1


def _make_inputs(key, B, in_feats, n_classes):
    kx, kw, kb, kl = jax.random.split(key, 4)
    x = jax.random.normal(kx, (B, in_feats), dtype=jnp.float32)
    weight = 0.1 * jax.random.normal(kw, (n_classes, in_feats), dtype=jnp.float32)
    bias = 0.01 * jax.random.normal(kb, (n_classes,), dtype=jnp.float32)
    labels = jax.random.randint(kl, (B,), 0, n_classes, dtype=jnp.int32)
    return x, weight, bias, labels


def _run_case(key, B, in_feats, n_classes, **kw):
    x, weight, bias, labels = _make_inputs(key, B, in_feats, n_classes)
    loss, prec1 = softmax_loss(x, weight, bias, labels, **kw)
    jax.block_until_ready((loss, prec1))
    ref_loss, ref_prec1 = reference(x, weight, bias, labels)
    assert jnp.allclose(loss, ref_loss, atol=1e-4, rtol=1e-4), (loss, ref_loss)
    assert jnp.allclose(prec1, ref_prec1, atol=1e-4), (prec1, ref_prec1)


if __name__ == "__main__":
    # Case 1: module default shapes (single class tile, class + feature padding).
    _run_case(jax.random.PRNGKey(0), B=8, in_feats=32, n_classes=10)
    # Case 2: multiple class tiles — exercises the online-logsumexp accumulator.
    _run_case(jax.random.PRNGKey(0), B=24, in_feats=160, n_classes=300)
    # Case 3: aligned classes (no-mask fast path), multiple batch tiles with
    # batch padding masked by the in-kernel reduction.
    _run_case(jax.random.PRNGKey(0), B=136, in_feats=256, n_classes=512, tb=64, tc=256)

    # bf16 operand path smoke test (halved weight HBM traffic, bf16 MXU path);
    # loss compared with a looser tolerance, accuracy only sanity-checked since
    # near-tie argmax rows may legitimately flip under bf16 rounding.
    x, weight, bias, labels = _make_inputs(jax.random.PRNGKey(0), 24, 160, 300)
    loss_bf16, prec_bf16 = softmax_loss(x, weight, bias, labels,
                                        compute_dtype=jnp.bfloat16)
    jax.block_until_ready((loss_bf16, prec_bf16))
    ref_loss, _ = reference(x, weight, bias, labels)
    assert jnp.allclose(loss_bf16, ref_loss, atol=5e-2, rtol=5e-2), (loss_bf16, ref_loss)
    assert 0.0 <= float(prec_bf16) <= 100.0

    # TODO(synk): the PyTorch forward also computes (and discards) top-5 accuracy
    # inside accuracy(); only the returned (nloss, prec1) pair is reproduced here.
    print("KERNEL_OK")
</pallas_src>

<mosaic_0001>
module attributes {stable_mosaic.version = 11 : i64} {
  func.func @softmax_loss_kernel(%arg0: i32, %arg1: i32, %arg2: memref<8x128xf32, #tpu.memory_space<vmem>>, %arg3: memref<128x128xf32, #tpu.memory_space<vmem>>, %arg4: memref<1x128xf32, #tpu.memory_space<vmem>>, %arg5: memref<8x1xi32, #tpu.memory_space<vmem>>, %arg6: memref<1x8x128xf32, #tpu.memory_space<vmem>>, %arg7: memref<1x8x128xf32, #tpu.memory_space<vmem>>, %arg8: memref<8x1xf32, #tpu.memory_space<vmem>>, %arg9: memref<8x1xf32, #tpu.memory_space<vmem>>, %arg10: memref<8x1xf32, #tpu.memory_space<vmem>>, %arg11: memref<8x1xf32, #tpu.memory_space<vmem>>) attributes {dimension_semantics = [#tpu.dimension_semantics<parallel>, #tpu.dimension_semantics<arbitrary>], iteration_bounds = array<i64: 1, 1>, scalar_prefetch = 0 : i64, scratch_operands = 4 : i64, tpu.core_type = #tpu.core_type<tc>, window_params = [{transform_indices = @transform_0, window_bounds = array<i64: 8, 128>}, {transform_indices = @transform_1, window_bounds = array<i64: 128, 128>}, {transform_indices = @transform_2, window_bounds = array<i64: 1, 128>}, {transform_indices = @transform_3, window_bounds = array<i64: 8, 1>}, {transform_indices = @transform_4, window_bounds = array<i64: 1, 8, 128>}, {transform_indices = @transform_5, window_bounds = array<i64: 1, 8, 128>}]} {
    %c0_i32 = arith.constant 0 : i32
    %0 = arith.cmpi eq, %arg1, %c0_i32 : i32
    %1 = arith.extui %0 : i1 to i32
    %c0_i32_0 = arith.constant 0 : i32
    %2 = arith.cmpi ne, %1, %c0_i32_0 : i32
    scf.if %2 {
      %cst_33 = arith.constant 0xFF800000 : f32
      %57 = vector.broadcast %cst_33 : f32 to vector<8x1xf32>
      %c0_34 = arith.constant 0 : index
      %c0_35 = arith.constant 0 : index
      %58 = vector.load %arg8[%c0_34, %c0_35] : memref<8x1xf32, #tpu.memory_space<vmem>>, vector<8x1xf32>
      tpu.vector_store %arg8[%c0_34, %c0_35], %57 {strides = array<i32>} : memref<8x1xf32, #tpu.memory_space<vmem>>, vector<8x1xf32>,
      %cst_36 = arith.constant 0.000000e+00 : f32
      %59 = vector.broadcast %cst_36 : f32 to vector<8x1xf32>
      %c0_37 = arith.constant 0 : index
      %c0_38 = arith.constant 0 : index
      %60 = vector.load %arg9[%c0_37, %c0_38] : memref<8x1xf32, #tpu.memory_space<vmem>>, vector<8x1xf32>
      tpu.vector_store %arg9[%c0_37, %c0_38], %59 {strides = array<i32>} : memref<8x1xf32, #tpu.memory_space<vmem>>, vector<8x1xf32>,
      %cst_39 = arith.constant 0.000000e+00 : f32
      %61 = vector.broadcast %cst_39 : f32 to vector<8x1xf32>
      %c0_40 = arith.constant 0 : index
      %c0_41 = arith.constant 0 : index
      %62 = vector.load %arg10[%c0_40, %c0_41] : memref<8x1xf32, #tpu.memory_space<vmem>>, vector<8x1xf32>
      tpu.vector_store %arg10[%c0_40, %c0_41], %61 {strides = array<i32>} : memref<8x1xf32, #tpu.memory_space<vmem>>, vector<8x1xf32>,
      %cst_42 = arith.constant 0.000000e+00 : f32
      %63 = vector.broadcast %cst_42 : f32 to vector<8x1xf32>
      %c0_43 = arith.constant 0 : index
      %c0_44 = arith.constant 0 : index
      %64 = vector.load %arg11[%c0_43, %c0_44] : memref<8x1xf32, #tpu.memory_space<vmem>>, vector<8x1xf32>
      tpu.vector_store %arg11[%c0_43, %c0_44], %63 {strides = array<i32>} : memref<8x1xf32, #tpu.memory_space<vmem>>, vector<8x1xf32>,
    } else {
    }
    %c0 = arith.constant 0 : index
    %c0_1 = arith.constant 0 : index
    %3 = vector.load %arg2[%c0, %c0_1] : memref<8x128xf32, #tpu.memory_space<vmem>>, vector<8x128xf32>
    %c0_2 = arith.constant 0 : index
    %c0_3 = arith.constant 0 : index
    %4 = vector.load %arg3[%c0_2, %c0_3] : memref<128x128xf32, #tpu.memory_space<vmem>>, vector<128x128xf32>
    %cst = arith.constant dense<0.000000e+00> : vector<8x128xf32>
    %5 = tpu.matmul %3, %4, %cst {dimension_numbers = #tpu.dot_dimension_numbers<[1], [0], [0], [1], [0, 0, 1, 1], [], []>} : vector<8x128xf32>, vector<128x128xf32>, vector<8x128xf32> -> vector<8x128xf32>
    %c0_4 = arith.constant 0 : index
    %c0_5 = arith.constant 0 : index
    %6 = vector.load %arg4[%c0_4, %c0_5] : memref<1x128xf32, #tpu.memory_space<vmem>>, vector<1x128xf32>
    %7 = vector.broadcast %6 : vector<1x128xf32> to vector<8x128xf32>
    %8 = arith.addf %5, %7 : vector<8x128xf32>
    %9 = tpu.iota {dimensions = array<i32: 1>} : vector<8x128xi32>
    %c128_i32 = arith.constant 128 : i32
    %10 = arith.muli %arg1, %c128_i32 : i32
    %11 = vector.broadcast %10 : i32 to vector<8x128xi32>
    %12 = arith.addi %9, %11 : vector<8x128xi32>
    %c10_i32 = arith.constant 10 : i32
    %13 = vector.broadcast %c10_i32 : i32 to vector<8x128xi32>
    %14 = arith.cmpi slt, %12, %13 : vector<8x128xi32>
    %cst_6 = arith.constant 0xFF800000 : f32
    %15 = vector.broadcast %cst_6 : f32 to vector<8x128xf32>
    %16 = arith.select %14, %8, %15 : vector<8x128xi1>, vector<8x128xf32>
    %cst_7 = arith.constant dense<0xFF800000> : vector<8xf32>
    %17 = vector.multi_reduction <maximumf>, %16, %cst_7 [1] : vector<8x128xf32> to vector<8xf32>
    %18 = vector.shape_cast %17 : vector<8xf32> to vector<8x1xf32>
    %19 = arith.sitofp %12 : vector<8x128xi32> to vector<8x128xf32>
    %20 = vector.broadcast %18 : vector<8x1xf32> to vector<8x128xf32>
    %21 = arith.cmpf oeq, %16, %20 : vector<8x128xf32>
    %cst_8 = arith.constant 3.000000e+38 : f32
    %22 = vector.broadcast %cst_8 : f32 to vector<8x128xf32>
    %23 = arith.select %21, %19, %22 : vector<8x128xi1>, vector<8x128xf32>
    %cst_9 = arith.constant dense<0x7F800000> : vector<8xf32>
    %24 = vector.multi_reduction <minimumf>, %23, %cst_9 [1] : vector<8x128xf32> to vector<8xf32>
    %25 = vector.shape_cast %24 : vector<8xf32> to vector<8x1xf32>
    %c0_10 = arith.constant 0 : index
    %c0_11 = arith.constant 0 : index
    %26 = vector.load %arg8[%c0_10, %c0_11] : memref<8x1xf32, #tpu.memory_space<vmem>>, vector<8x1xf32>
    %27 = arith.maximumf %26, %18 : vector<8x1xf32>
    %c0_12 = arith.constant 0 : index
    %c0_13 = arith.constant 0 : index
    %28 = vector.load %arg9[%c0_12, %c0_13] : memref<8x1xf32, #tpu.memory_space<vmem>>, vector<8x1xf32>
    %29 = arith.subf %26, %27 : vector<8x1xf32>
    %30 = math.exp %29 : vector<8x1xf32>
    %31 = arith.mulf %28, %30 : vector<8x1xf32>
    %32 = vector.broadcast %27 : vector<8x1xf32> to vector<8x128xf32>
    %33 = arith.subf %16, %32 : vector<8x128xf32>
    %34 = math.exp %33 : vector<8x128xf32>
    %cst_14 = arith.constant dense<0.000000e+00> : vector<8xf32>
    %35 = vector.multi_reduction <add>, %34, %cst_14 [1] : vector<8x128xf32> to vector<8xf32>
    %36 = vector.shape_cast %35 : vector<8xf32> to vector<8x1xf32>
    %37 = arith.addf %31, %36 : vector<8x1xf32>
    %c0_15 = arith.constant 0 : index
    %c0_16 = arith.constant 0 : index
    %38 = vector.load %arg9[%c0_15, %c0_16] : memref<8x1xf32, #tpu.memory_space<vmem>>, vector<8x1xf32>
    tpu.vector_store %arg9[%c0_15, %c0_16], %37 {strides = array<i32>} : memref<8x1xf32, #tpu.memory_space<vmem>>, vector<8x1xf32>,
    %c0_17 = arith.constant 0 : index
    %c0_18 = arith.constant 0 : index
    %39 = vector.load %arg8[%c0_17, %c0_18] : memref<8x1xf32, #tpu.memory_space<vmem>>, vector<8x1xf32>
    tpu.vector_store %arg8[%c0_17, %c0_18], %27 {strides = array<i32>} : memref<8x1xf32, #tpu.memory_space<vmem>>, vector<8x1xf32>,
    %40 = arith.cmpf ogt, %18, %26 : vector<8x1xf32>
    %c0_19 = arith.constant 0 : index
    %c0_20 = arith.constant 0 : index
    %41 = vector.load %arg11[%c0_19, %c0_20] : memref<8x1xf32, #tpu.memory_space<vmem>>, vector<8x1xf32>
    %42 = arith.select %40, %25, %41 : vector<8x1xi1>, vector<8x1xf32>
    %c0_21 = arith.constant 0 : index
    %c0_22 = arith.constant 0 : index
    %43 = vector.load %arg11[%c0_21, %c0_22] : memref<8x1xf32, #tpu.memory_space<vmem>>, vector<8x1xf32>
    tpu.vector_store %arg11[%c0_21, %c0_22], %42 {strides = array<i32>} : memref<8x1xf32, #tpu.memory_space<vmem>>, vector<8x1xf32>,
    %c0_23 = arith.constant 0 : index
    %c0_24 = arith.constant 0 : index
    %44 = vector.load %arg5[%c0_23, %c0_24] : memref<8x1xi32, #tpu.memory_space<vmem>>, vector<8x1xi32>
    %c0_25 = arith.constant 0 : index
    %c0_26 = arith.constant 0 : index
    %45 = vector.load %arg10[%c0_25, %c0_26] : memref<8x1xf32, #tpu.memory_space<vmem>>, vector<8x1xf32>
    %46 = vector.broadcast %44 : vector<8x1xi32> to vector<8x128xi32>
    %47 = arith.cmpi eq, %12, %46 : vector<8x128xi32>
    %cst_27 = arith.constant 0.000000e+00 : f32
    %48 = vector.broadcast %cst_27 : f32 to vector<8x128xf32>
    %49 = arith.select %47, %8, %48 : vector<8x128xi1>, vector<8x128xf32>
    %cst_28 = arith.constant dense<0.000000e+00> : vector<8xf32>
    %50 = vector.multi_reduction <add>, %49, %cst_28 [1] : vector<8x128xf32> to vector<8xf32>
    %51 = vector.shape_cast %50 : vector<8xf32> to vector<8x1xf32>
    %52 = arith.addf %45, %51 : vector<8x1xf32>
    %c0_29 = arith.constant 0 : index
    %c0_30 = arith.constant 0 : index
    %53 = vector.load %arg10[%c0_29, %c0_30] : memref<8x1xf32, #tpu.memory_space<vmem>>, vector<8x1xf32>
    tpu.vector_store %arg10[%c0_29, %c0_30], %52 {strides = array<i32>} : memref<8x1xf32, #tpu.memory_space<vmem>>, vector<8x1xf32>,
    %c0_i32_31 = arith.constant 0 : i32
    %54 = arith.cmpi eq, %arg1, %c0_i32_31 : i32
    %55 = arith.extui %54 : i1 to i32
    %c0_i32_32 = arith.constant 0 : i32
    %56 = arith.cmpi ne, %55, %c0_i32_32 : i32
    scf.if %56 {
      %c0_33 = arith.constant 0 : index
      %c0_34 = arith.constant 0 : index
      %57 = vector.load %arg8[%c0_33, %c0_34] : memref<8x1xf32, #tpu.memory_space<vmem>>, vector<8x1xf32>
      %c0_35 = arith.constant 0 : index
      %c0_36 = arith.constant 0 : index
      %58 = vector.load %arg9[%c0_35, %c0_36] : memref<8x1xf32, #tpu.memory_space<vmem>>, vector<8x1xf32>
      %59 = math.log %58 : vector<8x1xf32>
      %60 = arith.addf %57, %59 : vector<8x1xf32>
      %c0_37 = arith.constant 0 : index
      %c0_38 = arith.constant 0 : index
      %61 = vector.load %arg10[%c0_37, %c0_38] : memref<8x1xf32, #tpu.memory_space<vmem>>, vector<8x1xf32>
      %62 = arith.subf %60, %61 : vector<8x1xf32>
      %c0_39 = arith.constant 0 : index
      %c0_40 = arith.constant 0 : index
      %63 = vector.load %arg11[%c0_39, %c0_40] : memref<8x1xf32, #tpu.memory_space<vmem>>, vector<8x1xf32>
      %c0_41 = arith.constant 0 : index
      %c0_42 = arith.constant 0 : index
      %64 = vector.load %arg5[%c0_41, %c0_42] : memref<8x1xi32, #tpu.memory_space<vmem>>, vector<8x1xi32>
      %65 = arith.sitofp %64 : vector<8x1xi32> to vector<8x1xf32>
      %66 = arith.cmpf oeq, %63, %65 : vector<8x1xf32>
      %67 = arith.extui %66 : vector<8x1xi1> to vector<8x1xi32>
      %68 = arith.sitofp %67 : vector<8x1xi32> to vector<8x1xf32>
      %69 = tpu.iota {dimensions = array<i32: 0>} : vector<8x1xi32>
      %c8_i32 = arith.constant 8 : i32
      %70 = arith.muli %arg0, %c8_i32 : i32
      %71 = vector.broadcast %70 : i32 to vector<8x1xi32>
      %72 = arith.addi %69, %71 : vector<8x1xi32>
      %c8_i32_43 = arith.constant 8 : i32
      %73 = vector.broadcast %c8_i32_43 : i32 to vector<8x1xi32>
      %74 = arith.cmpi slt, %72, %73 : vector<8x1xi32>
      %cst_44 = arith.constant 0.000000e+00 : f32
      %75 = vector.broadcast %cst_44 : f32 to vector<8x1xf32>
      %76 = arith.select %74, %62, %75 : vector<8x1xi1>, vector<8x1xf32>
      %77 = vector.shape_cast %76 : vector<8x1xf32> to vector<1x8x1xf32>
      %cst_45 = arith.constant dense<0.000000e+00> : vector<1xf32>
      %78 = vector.multi_reduction <add>, %77, %cst_45 [1, 2] : vector<1x8x1xf32> to vector<1xf32>
      %79 = vector.shape_cast %78 : vector<1xf32> to vector<1x1x1xf32>
      %80 = vector.extract %79[0, 0, 0] : f32 from vector<1x1x1xf32>
      %cst_46 = arith.constant 0.000000e+00 : f32
      %81 = vector.broadcast %cst_46 : f32 to vector<8x1xf32>
      %82 = arith.select %74, %68, %81 : vector<8x1xi1>, vector<8x1xf32>
      %83 = vector.shape_cast %82 : vector<8x1xf32> to vector<1x8x1xf32>
      %cst_47 = arith.constant dense<0.000000e+00> : vector<1xf32>
      %84 = vector.multi_reduction <add>, %83, %cst_47 [1, 2] : vector<1x8x1xf32> to vector<1xf32>
      %85 = vector.shape_cast %84 : vector<1xf32> to vector<1x1x1xf32>
      %86 = vector.extract %85[0, 0, 0] : f32 from vector<1x1x1xf32>
      %87 = vector.broadcast %80 : f32 to vector<1x8x128xf32>
      %c0_48 = arith.constant 0 : index
      %c0_49 = arith.constant 0 : index
      %c0_50 = arith.constant 0 : index
      %88 = vector.load %arg6[%c0_48, %c0_49, %c0_50] : memref<1x8x128xf32, #tpu.memory_space<vmem>>, vector<1x8x128xf32>
      tpu.vector_store %arg6[%c0_48, %c0_49, %c0_50], %87 {strides = array<i32>} : memref<1x8x128xf32, #tpu.memory_space<vmem>>, vector<1x8x128xf32>,
      %89 = vector.broadcast %86 : f32 to vector<1x8x128xf32>
      %c0_51 = arith.constant 0 : index
      %c0_52 = arith.constant 0 : index
      %c0_53 = arith.constant 0 : index
      %90 = vector.load %arg7[%c0_51, %c0_52, %c0_53] : memref<1x8x128xf32, #tpu.memory_space<vmem>>, vector<1x8x128xf32>
      tpu.vector_store %arg7[%c0_51, %c0_52, %c0_53], %89 {strides = array<i32>} : memref<1x8x128xf32, #tpu.memory_space<vmem>>, vector<1x8x128xf32>,
    } else {
    }
    return
  }
  func.func @transform_0(%arg0: i32, %arg1: i32) -> (i32, i32) {
    %c0_i32 = arith.constant 0 : i32
    %c0_i32_0 = arith.constant 0 : i32
    return %arg0, %c0_i32 : i32, i32
  }
  func.func @transform_1(%arg0: i32, %arg1: i32) -> (i32, i32) {
    %c0_i32 = arith.constant 0 : i32
    %c0_i32_0 = arith.constant 0 : i32
    return %c0_i32, %arg1 : i32, i32
  }
  func.func @transform_2(%arg0: i32, %arg1: i32) -> (i32, i32) {
    %c0_i32 = arith.constant 0 : i32
    %c0_i32_0 = arith.constant 0 : i32
    return %c0_i32, %arg1 : i32, i32
  }
  func.func @transform_3(%arg0: i32, %arg1: i32) -> (i32, i32) {
    %c0_i32 = arith.constant 0 : i32
    %c0_i32_0 = arith.constant 0 : i32
    return %arg0, %c0_i32 : i32, i32
  }
  func.func @transform_4(%arg0: i32, %arg1: i32) -> (i32, i32, i32) {
    %c0_i32 = arith.constant 0 : i32
    %c0_i32_0 = arith.constant 0 : i32
    %c0_i32_1 = arith.constant 0 : i32
    return %arg0, %c0_i32, %c0_i32_0 : i32, i32, i32
  }
  func.func @transform_5(%arg0: i32, %arg1: i32) -> (i32, i32, i32) {
    %c0_i32 = arith.constant 0 : i32
    %c0_i32_0 = arith.constant 0 : i32
    %c0_i32_1 = arith.constant 0 : i32
    return %arg0, %c0_i32, %c0_i32_0 : i32, i32, i32
  }
}

</mosaic_0001>

<bundles_post_ra>
// kernel: tpu_custom_call.1
= control target key start
LH: loop header
LB: loop body
LE: loop exit
PB: predicated region body
PF: predicated region fallthrough
CT: control target
= control target key end

     0   :  { %11 = vsyncpa [#allocation7], 0  ;;  %s392_s0 = inlined_call_operand.vmem [shape: f32[8,128], index: 0, kind: input, shape index: {}]   ;;  %s393_s1 = inlined_call_operand.hbm [shape: f32[128,128], index: 1, kind: input, shape index: {}]   ;;  %s394_s2 = inlined_call_operand.vmem [shape: f32[1,128], index: 2, kind: input, shape index: {}]   ;;  %s395_s3 = inlined_call_operand.vmem [shape: s32[8,1], index: 3, kind: input, shape index: {}]   ;;  %s396_s4 = inlined_call_operand.hbm [shape: f32[1,8,128], index: 4, kind: output, shape index: {0}]   ;;  %s397_s5 = inlined_call_operand.hbm [shape: f32[1,8,128], index: 5, kind: output, shape index: {1}]  }
   0x1   :  { %12 = vsyncpa [#allocation8], 0 }
   0x2   :  { %13 = vsyncpa [#allocation11], 0  ;;  %s20_s20 = sshll.u32 %s393_s1, 4  ;;  %s318_s21 = smov [#allocation6]   ;;  %s21_s20 = int_to_ptr.hbm [resolvable:$true] %s20_s20 }
   0x3   :  { %s22_s22 = sshll.u32 %s318_s21, 4  ;;  %s319_s23 = smov 128   ;;  %s23_s22 = int_to_ptr.vmem [resolvable:$true] %s22_s22 }
   0x4   :  { %s320_s24 = smov 8  }
   0x5   :  { %28 = dma.hbm_to_vmem [thread:$0]  %s21_s20, 2048, %s23_s22, [#allocation7], %s319_s23, %s319_s23, %s320_s24  }
   0x6   :  { %312 = dma.done.wait [#allocation7], 2048  }
   0x7   :  { %313 = vsyncadd [#allocation7], 4294965248  ;;  %v62_v0 = vld [vmem:[#allocation6 + $0x78] sm:$0xff]  ;;  %v61_v1 = vld [vmem:[#allocation6 + $0x70] sm:$0xff]  ;;  %v321_v2 = vmov 0   ;;  %vm41_vm0 = vcmask 7168   ;;  %v87_v20 = vlaneseq }
   0x8   :  { %67 = vmatpush.msra.mxu0 %v62_v0  ;;  %232 = vset.pattern.permute.xlu1 %v321_v2  ;;  %v60_v3 = vld [vmem:[#allocation6 + $0x68] sm:$0xff]  ;;  %v59_v4 = vld [vmem:[#allocation6 + $0x60] sm:$0xff]  ;;  %v58_v6 = vld [vmem:[#allocation6 + $0x58] sm:$0xff]  ;;  %v322_v19 = vmov 0.0   ;;  %v323_v28 = vmov -inf   ;;  %s192_s6 = sshll.u32 %s396_s4, 4  ;;  %s193_s6 = int_to_ptr.hbm [resolvable:$true] %s192_s6 }
   0x9   :  { %231 = vset.pattern.permute.xlu0 %v321_v2  ;;  %v362_v5 = vld [vmem:[%s395_s3] sm:$0xff]  ;;  %v57_v7 = vld [vmem:[#allocation6 + $0x50] sm:$0xff]  ;;  %v56_v8 = vld [vmem:[#allocation6 + $0x48] sm:$0xff]  ;;  %44 = vst.msk [vmem:[#allocation4] sm:$0xff] %vm41_vm0, %v322_v19  ;;  %v88_v21 = vand.u32 127, %v87_v20  ;;  %s325_s8 = smov [#allocation10]  }
   0xa   :  { %68 = vmatpush.msra.mxu0 %v61_v1  ;;  %129 = vperm.xlu1 %232, %v362_v5   ;;  %v55_v9 = vld [vmem:[#allocation6 + $0x40] sm:$0xff]  ;;  %v54_v10 = vld [vmem:[#allocation6 + $0x38] sm:$0xff]  ;;  %v53_v11 = vld [vmem:[#allocation6 + $0x30] sm:$0xff]  ;;  %43 = vst.msk [vmem:[#allocation3] sm:$0xff] %vm41_vm0, %v322_v19  ;;  %v149_v58 = vcvt.s32.f32 %v362_v5  ;;  %s201_s9 = sshll.u32 %s325_s8, 4  ;;  %s203_s12 = sshll.u32 %s397_s5, 4  ;;  %s202_s9 = int_to_ptr.vmem [resolvable:$true] %s201_s9  ;;  %s204_s12 = int_to_ptr.hbm [resolvable:$true] %s203_s12 }
   0xb   :  { %v52_v12 = vld [vmem:[#allocation6 + $0x28] sm:$0xff]  ;;  %v51_v13 = vld [vmem:[#allocation6 + $0x20] sm:$0xff]  ;;  %v50_v14 = vld [vmem:[#allocation6 + $0x18] sm:$0xff]  ;;  %45 = vst.msk [vmem:[#allocation5] sm:$0xff] %vm41_vm0, %v322_v19  ;;  %vm92_vm2 = vcmp.lt.s32.totalorder %v88_v21, 10  ;;  %v96_v31 = vcvt.s32.f32 %v88_v21 }
   0xc   :  { %69 = vmatpush.msra.mxu0 %v60_v3  ;;  %v49_v15 = vld [vmem:[#allocation6 + $0x10] sm:$0xff]  ;;  %v48_v16 = vld [vmem:[#allocation6 + $0x8] sm:$0xff]  ;;  %v47_v17 = vld [vmem:[#allocation6] sm:$0xff]  ;;  %42 = vst.msk [vmem:[#allocation2] sm:$0xff] %vm41_vm0, %v323_v28 }
   0xd   :  { %v46_v18 = vld [vmem:[%s392_s0] sm:$0xff]  ;;  %s324_s0 = smov [#allocation9]  }
   0xe   :  { %70 = vmatpush.msra.mxu0 %v59_v4  ;;  %v233_v22 = vld [vmem:[%s394_s2] ss:$0 sm:$0xff]  ;;  %s190_s2 = sshll.u32 %s324_s0, 4  ;;  %s191_s2 = int_to_ptr.vmem [resolvable:$true] %s190_s2 }
  0x10   :  { %71 = vmatpush.msra.mxu0 %v58_v6  ;;  %v127_v29 = vld [vmem:[#allocation4] sm:$0xff] }
  0x11   :  { %v103_v47 = vld [vmem:[#allocation3] sm:$0xff] }
  0x12   :  { %72 = vmatpush.msra.mxu0 %v57_v7  ;;  %v123_v38 = vld [vmem:[#allocation5] sm:$0xff] }
  0x13   :  { %v101_v30 = vld [vmem:[#allocation2] sm:$0xff] }
  0x14   :  { %73 = vmatpush.msra.mxu0 %v56_v8 }
  0x16   :  { %74 = vmatpush.msra.mxu0 %v55_v9 }
  0x18   :  { %75 = vmatpush.msra.mxu0 %v54_v10 }
  0x1a   :  { %76 = vmatpush.msra.mxu0 %v53_v11 }
  0x1c   :  { %77 = vmatpush.msra.mxu0 %v52_v12 }
  0x1e   :  { %78 = vmatpush.msra.mxu0 %v51_v13 }
  0x20   :  { %79 = vmatpush.msra.mxu0 %v50_v14 }
  0x22   :  { %80 = vmatpush.msra.mxu0 %v49_v15 }
  0x24   :  { %81 = vmatpush.msra.mxu0 %v48_v16 }
  0x26   :  { %82 = vmatpush.msra.mxu0 %v47_v17 }
  0x27   :  { %83 = vmatmul.f32.vlgmr.msra.gmra.mxu0 %v46_v18 }
  0x7c   :  { %v130_v23 = vpop.permute.xlu1 %129 }
  0x7d   :  { %vm131_vm1 = vcmp.eq.s32.totalorder %v88_v21, %v130_v23 }
  0xa4   :  { %v84_v24 = vpop.f32.mrf.mxu0 }
  0xa5   :  { %v85_v25 = vadd.f32 %v233_v22, %v84_v24 }
  0xa7   :  { %v132_v26 = vsel %vm131_vm1, %v85_v25, 0.0  ;;  %v93_v27 = vsel %vm92_vm2, %v85_v25, -inf }
  0xa8   :  { %133 = vadd.xlane.f32.xlu2 %v132_v26  ;;  %94 = vmax.xlane.f32.xlu0 %v93_v27 }
 0x11b   :  { %v134_v32 = vpop.xlane.xlu2 %133  ;;  %v95_v33 = vpop.xlane.xlu0 %94 }
 0x11c   :  { %v135_v34 = vadd.f32 %v134_v32, %v127_v29  ;;  %v102_v35 = vmax.f32 %v101_v30, %v95_v33  ;;  %vm97_vm3 = vcmp.eq.f32.partialorder %v93_v27, %v95_v33  ;;  %vm122_vm4 = vcmp.gt.f32.partialorder %v95_v33, %v101_v30 }
 0x11d   :  { %v98_v36 = vsel %vm97_vm3, %v96_v31, 3e+38 }
 0x11e   :  { %136 = vst.msk [vmem:[#allocation4] sm:$0xff] %vm41_vm0, %v135_v34  ;;  %v104_v37 = vsub.f32 %v101_v30, %v102_v35  ;;  %99 = vmin.xlane.f32.xlu2 %v98_v36  ;;  %110 = vperm.xlu0 %231, %v102_v35  }
 0x11f   :  { %121 = vst.msk [vmem:[#allocation2] sm:$0xff] %vm41_vm0, %v102_v35 }
 0x120   :  { %v105_v45 = vmul.f32 1.442695, %v104_v37 }
 0x125   :  { %v145_v56 = vld [vmem:[#allocation4] sm:$0xff] }
 0x126   :  { %v140_v54 = vld [vmem:[#allocation2] sm:$0xff] }
 0x190   :  { %v111_v39 = vpop.permute.xlu0 %110 }
 0x191   :  { %v113_v40 = vsub.f32 %v93_v27, %v111_v39  ;;  %v100_v41 = vpop.xlane.xlu2 %99 }
 0x192   :  { %v124_v42 = vsel %vm122_vm4, %v100_v41, %v123_v38 }
 0x193   :  { %v114_v43 = vmul.f32 1.442695, %v113_v40  ;;  %125 = vst.msk [vmem:[#allocation5] sm:$0xff] %vm41_vm0, %v124_v42 }
 0x195   :  { %234 = vpow2.f32 %v114_v43 }
 0x196   :  { %236 = vpow2.f32 %v105_v45 }
 0x19a   :  { %v147_v59 = vld [vmem:[#allocation5] sm:$0xff] }
 0x19b   :  { %v235_v44 = vpop.eup %234  ;;  %vm150_vm5 = vcmp.eq.f32.partialorder %v147_v59, %v149_v58 }
 0x19c   :  { %116 = vadd.xlane.f32.xlu1 %v235_v44  ;;  %v237_v46 = vpop.eup %236  ;;  %v218_v61 = vsel %vm150_vm5, 1.0, %v322_v19 }
 0x19d   :  { %v107_v48 = vmul.f32 %v237_v46, %v103_v47  ;;  %v171_v62 = vsel %vm41_vm0, %v218_v61, 0.0 }
 0x20f   :  { %v117_v49 = vpop.xlane.xlu1 %116 }
 0x210   :  { %v118_v50 = vadd.f32 %v117_v49, %v107_v48 }
 0x212   :  { %120 = vst.msk [vmem:[#allocation3] sm:$0xff] %vm41_vm0, %v118_v50 }
 0x219   :  { %v141_v51 = vld [vmem:[#allocation3] sm:$0xff] }
 0x21a   :  { %238 = vlog2.f32 %v141_v51 }
 0x220   :  { %v239_v52 = vpop.eup %238 }
 0x221   :  { %v143_v53 = vmul.f32 0.6931472, %v239_v52 }
 0x223   :  { %v144_v55 = vadd.f32 %v143_v53, %v140_v54 }
 0x225   :  { %v146_v57 = vsub.f32 %v144_v55, %v145_v56 }
 0x227   :  { %v160_v60 = vsel %vm41_vm0, %v146_v57, 0.0 }
 0x228   :  { %161 = vadd.xlane.f32.xlu2 %v160_v60 }
 0x230   :  { %172 = vadd.xlane.f32.xlu2 %v171_v62 }
 0x29b   :  { %v162_v63 = vpop.xlane.xlu2 %161 }
 0x29c   :  { %v163_v0 = vrot.slane %v162_v63, 4 }
 0x29e   :  { %v164_v1 = vadd.f32 %v163_v0, %v162_v63 }
 0x2a0   :  { %v165_v2 = vrot.slane %v164_v1, 2 }
 0x2a2   :  { %v166_v3 = vadd.f32 %v165_v2, %v164_v1 }
 0x2a3   :  { %v173_v4 = vpop.xlane.xlu2 %172 }
 0x2a4   :  { %v174_v6 = vrot.slane %v173_v4, 4  ;;  %v167_v7 = vrot.slane %v166_v3, 1 }
 0x2a6   :  { %v175_v8 = vadd.f32 %v174_v6, %v173_v4  ;;  %v168_v5 = vadd.f32 %v167_v7, %v166_v3 }
 0x2a8   :  { %v176_v9 = vrot.slane %v175_v8, 2  ;;  %219 = vpush %v168_v5 }
 0x2aa   :  { %v177_v10 = vadd.f32 %v176_v9, %v175_v8 }
 0x2ac   :  { %v178_v11 = vrot.slane %v177_v10, 1 }
 0x2ae   :  { %v179_v12 = vadd.f32 %v178_v11, %v177_v10 }
 0x2b0   :  { %221 = vpush %v179_v12 }
 0x2d9   :  { %s220_s7 = spop %219 }
 0x2da   :  { %v181_v13 = vstv %s220_s7 }
 0x2db   :  { %182 = vst [vmem:[#allocation9] sm:$0xff] %v181_v13 }
 0x2dc   :  { %195 = dma.vmem_to_hbm [thread:$0]  %s191_s2, 128, %s193_s6, [#allocation8]  }
 0x2e1   :  { %s222_s13 = spop %221 }
 0x2e2   :  { %v183_v14 = vstv %s222_s13 }
 0x2e3   :  { %184 = vst [vmem:[#allocation10] sm:$0xff] %v183_v14 }
 0x2e4   :  { %206 = dma.vmem_to_hbm [thread:$0]  %s202_s9, 128, %s204_s12, [#allocation11]  }
 0x2e5   :  { %314 = dma.done.wait [#allocation8], 128  }
 0x2e6   :  { %315 = vsyncadd [#allocation8], 4294967168 }
 0x2e7   :  { %316 = dma.done.wait [#allocation11], 128  }
 0x2e8   :  { %317 = vsyncadd [#allocation11], 4294967168 }
 0x2e9   :  { %215 = vsyncpa [#allocation7], 1 }
 0x2ea   :  { %216 = vsyncpa [#allocation8], 1 }
 0x2eb   :  { %217 = vsyncpa [#allocation11], 1 }

</bundles_post_ra>
